<compile_context>
chip_gen: v7x
topology: tpu7x:2x2x1
jax: 0.10.0
libtpu: 0.0.40
codegen_flags: <defaults>
</compile_context>

<pallas_src>
import functools
import jax
import jax.numpy as jnp
from jax.experimental import pallas as pl
from jax.experimental.pallas import tpu as pltpu


# ---------------------------------------------------------------------------
# Pallas kernel: fused (W @ padded-patches) + bias + other
# ---------------------------------------------------------------------------
def _conv_add_kernel(w_ref, p_ref, b_ref, o_ref, out_ref):
    # w_ref  : (OC, K)      weight reshaped OIHW -> (OC, K)  (no transpose)
    # p_ref  : (N, K, Mf)   im2col patches, already padded to the full output
    #                       extent (border columns are zero)
    # b_ref  : (OC, 1)      bias, broadcast along lanes
    # o_ref  : (N, OC, Mf)  `other`, NCHW flattened (aliased with out_ref)
    # out_ref: (N, OC, Mf)  transposed, lane-dense output
    w = w_ref[...]
    b = b_ref[...]                      # hoisted once; broadcast along lanes
    n_batch = p_ref.shape[0]
    for n in range(n_batch):            # static unroll; N is tiny (1 here)
        conv = jnp.dot(w, p_ref[n], preferred_element_type=jnp.float32)  # (OC, Mf)
        out_ref[n] = (conv + b + o_ref[n].astype(jnp.float32)).astype(out_ref.dtype)


@functools.partial(jax.jit, static_argnames=("kernel", "stride", "pad"))
def conv_patchify_add(x, weight, bias, other, *, kernel=8, stride=8, pad=8):
    """Conv2d(C, OC, kernel, stride=kernel, padding=kernel)(x) + other, NCHW in/out."""
    N, C, H, W = x.shape
    OC, Cw, KH, KW = weight.shape
    # This lowering relies on the exact patchify structure of the module.
    assert Cw == C
    assert KH == kernel and KW == kernel and stride == kernel and pad == kernel, (
        "lowering assumes kernel == stride == padding")
    assert H % kernel == 0 and W % kernel == 0, "H, W must be multiples of kernel"

    OHi, OWi = H // kernel, W // kernel        # interior output positions
    OH, OW = OHi + 2, OWi + 2                  # == (H + 2*pad - kernel)//stride + 1
    K = C * KH * KW
    Mf = OH * OW

    # Interior im2col in transposed (K, .) form, then zero-pad the spatial dims
    # to the full output extent so a SINGLE matmul produces all positions
    # (border columns are zero -> border outputs become bias + other, which is
    # exactly the conv result there since pad == stride == kernel).
    p = x.reshape(N, C, OHi, KH, OWi, KW)
    p = jnp.transpose(p, (0, 1, 3, 5, 2, 4))            # (N, C, KH, KW, OHi, OWi)
    p = jnp.pad(p, ((0, 0),) * 4 + ((1, 1), (1, 1)))    # (N, C, KH, KW, OH, OW)
    p = p.reshape(N, K, Mf)

    w2 = weight.reshape(OC, K)                  # OIHW -> (OC, K), no transpose
    b2 = bias.reshape(OC, 1).astype(jnp.float32)
    om = other.reshape(N, OC, Mf).astype(x.dtype)   # NCHW flatten, free

    # Grid-less pallas_call: whole working set (< 0.5 MiB) sits in VMEM on
    # v5e / v6e / v7x; no grid=(1,) pipeline machinery.  `other` is donated
    # into the output (same shape/dtype, accumulate-into).
    # (If N ever grows, add a "parallel" grid axis over N for both v7x TCs.)
    vmem = pltpu.MemorySpace.VMEM
    itemsize = jnp.dtype(x.dtype).itemsize
    cost = pl.CostEstimate(
        flops=2 * N * OC * K * Mf,
        transcendentals=0,
        bytes_accessed=(w2.size + p.size + b2.size + 2 * om.size) * itemsize,
    )
    out = pl.pallas_call(
        _conv_add_kernel,
        out_shape=jax.ShapeDtypeStruct((N, OC, Mf), x.dtype),
        in_specs=[
            pl.BlockSpec(memory_space=vmem),   # w2
            pl.BlockSpec(memory_space=vmem),   # padded patches
            pl.BlockSpec(memory_space=vmem),   # bias
            pl.BlockSpec(memory_space=vmem),   # other
        ],
        out_specs=pl.BlockSpec(memory_space=vmem),
        input_output_aliases={3: 0},           # donate `other` into the output
        cost_estimate=cost,
    )(w2, p, b2, om)

    # (N, OC, OH*OW) -> NCHW, free reshape (no transpose)
    return out.reshape(N, OC, OH, OW)


# ---------------------------------------------------------------------------
# Model wrapper mirroring the PyTorch module
# ---------------------------------------------------------------------------
class Model:
    def __init__(self, key):
        k_w, k_b = jax.random.split(key)
        C_in, C_out, KS = 8, 8, 8
        fan_in = C_in * KS * KS
        bound = 1.0 / (fan_in ** 0.5)
        self.weight = jax.random.uniform(
            k_w, (C_out, C_in, KS, KS), jnp.float32, -bound, bound)
        self.bias = jax.random.uniform(k_b, (C_out,), jnp.float32, -bound, bound)

    def __call__(self, x1, other=None):
        # TODO(synk): PyTorch draws torch.randn for `other` per call; here the
        # default is deterministic noise from a fixed key (no in-graph RNG).
        if other is None:
            N, _, H, W = x1.shape
            OH, OW = H // 8 + 2, W // 8 + 2
            other = jax.random.normal(
                jax.random.PRNGKey(42), (N, 8, OH, OW), jnp.float32)
        return conv_patchify_add(x1, self.weight, self.bias, other)


if __name__ == "__main__":
    key = jax.random.PRNGKey(0)
    k_model, k_x, k_other = jax.random.split(key, 3)

    # Small shapes consistent with the module: N=1, C=8, H=W=64 -> OH=OW=10
    N, C, H, W = 1, 8, 64, 64
    x1 = jax.random.normal(k_x, (N, C, H, W), jnp.float32)

    model = Model(k_model)

    OH = (H + 2 * 8 - 8) // 8 + 1
    OW = (W + 2 * 8 - 8) // 8 + 1
    other = jax.random.normal(k_other, (N, 8, OH, OW), jnp.float32)

    out = model(x1, other)
    out = jax.block_until_ready(out)

    # Reference check with lax conv (not part of the kernel path)
    ref = jax.lax.conv_general_dilated(
        x1, model.weight, window_strides=(8, 8),
        padding=[(8, 8), (8, 8)],
        dimension_numbers=("NCHW", "OIHW", "NCHW"),
    ) + model.bias[None, :, None, None] + other

    assert out.shape == (N, 8, OH, OW), out.shape
    assert jnp.allclose(out, ref, atol=1e-4, rtol=1e-4), float(jnp.max(jnp.abs(out - ref)))

    print("KERNEL_OK")
</pallas_src>

<mosaic_0001>
module attributes {stable_mosaic.version = 11 : i64} {
  func.func @_conv_add_kernel(%arg0: memref<8x512xf32, #tpu.memory_space<vmem>>, %arg1: memref<1x512x100xf32, #tpu.memory_space<vmem>>, %arg2: memref<8x1xf32, #tpu.memory_space<vmem>>, %arg3: memref<1x8x100xf32, #tpu.memory_space<vmem>>, %arg4: memref<1x8x100xf32, #tpu.memory_space<vmem>>) attributes {dimension_semantics = [], scalar_prefetch = 0 : i64, scratch_operands = 0 : i64, tpu.core_type = #tpu.core_type<tc>} {
    %c0 = arith.constant 0 : index
    %c0_0 = arith.constant 0 : index
    %0 = vector.load %arg0[%c0, %c0_0] : memref<8x512xf32, #tpu.memory_space<vmem>>, vector<8x512xf32>
    %c0_1 = arith.constant 0 : index
    %c0_2 = arith.constant 0 : index
    %1 = vector.load %arg2[%c0_1, %c0_2] : memref<8x1xf32, #tpu.memory_space<vmem>>, vector<8x1xf32>
    %c0_3 = arith.constant 0 : index
    %c0_4 = arith.constant 0 : index
    %c0_5 = arith.constant 0 : index
    %2 = vector.load %arg1[%c0_3, %c0_4, %c0_5] : memref<1x512x100xf32, #tpu.memory_space<vmem>>, vector<1x512x100xf32>
    %3 = vector.shape_cast %2 : vector<1x512x100xf32> to vector<512x100xf32>
    %cst = arith.constant dense<0.000000e+00> : vector<8x100xf32>
    %4 = tpu.matmul %0, %3, %cst {dimension_numbers = #tpu.dot_dimension_numbers<[1], [0], [0], [1], [0, 0, 1, 1], [], []>} : vector<8x512xf32>, vector<512x100xf32>, vector<8x100xf32> -> vector<8x100xf32>
    %5 = vector.broadcast %1 : vector<8x1xf32> to vector<8x100xf32>
    %6 = arith.addf %4, %5 : vector<8x100xf32>
    %c0_6 = arith.constant 0 : index
    %c0_7 = arith.constant 0 : index
    %c0_8 = arith.constant 0 : index
    %7 = vector.load %arg3[%c0_6, %c0_7, %c0_8] : memref<1x8x100xf32, #tpu.memory_space<vmem>>, vector<1x8x100xf32>
    %8 = vector.shape_cast %7 : vector<1x8x100xf32> to vector<8x100xf32>
    %9 = arith.addf %6, %8 : vector<8x100xf32>
    %c0_9 = arith.constant 0 : index
    %c0_10 = arith.constant 0 : index
    %c0_11 = arith.constant 0 : index
    %10 = vector.load %arg4[%c0_9, %c0_10, %c0_11] : memref<1x8x100xf32, #tpu.memory_space<vmem>>, vector<1x8x100xf32>
    %11 = vector.shape_cast %10 : vector<1x8x100xf32> to vector<8x100xf32>
    %12 = vector.shape_cast %9 : vector<8x100xf32> to vector<1x8x100xf32>
    tpu.vector_store %arg4[%c0_9, %c0_10, %c0_11], %12 {strides = array<i32>} : memref<1x8x100xf32, #tpu.memory_space<vmem>>, vector<1x8x100xf32>,
    return
  }
}

</mosaic_0001>

<bundles_post_ra>
// kernel: conv_patchify_add.1
= control target key start
LH: loop header
LB: loop body
LE: loop exit
PB: predicated region body
PF: predicated region fallthrough
CT: control target
= control target key end

     0   :  { %v375_v3 = vmov 0   ;;  %vm233_vm0 = vcmask 818176   ;;  %s614_s1 = inlined_call_operand.vmem [shape: f32[1,512,100], index: 1, kind: input, shape index: {}]   ;;  %s615_s0 = inlined_call_operand.vmem [shape: f32[8,512], index: 0, kind: input, shape index: {}]   ;;  %s616_s2 = inlined_call_operand.vmem [shape: f32[8,1], index: 2, kind: input, shape index: {}]   ;;  %s617_s3 = inlined_call_operand.vmem [shape: f32[1,8,100], index: 3, kind: input, shape index: {}, may-alias: {3,4}]   ;;  %s618_s4 = inlined_call_operand.vmem [shape: f32[1,8,100], index: 4, kind: output, shape index: {}, may-alias: {3,4}]  }
   0x1   :  { %v38_v0 = vld [vmem:[%s614_s1 + $0x80] sm:$0xff]  ;;  %v39_v1 = vld [vmem:[%s614_s1 + $0x88] sm:$0xff]  ;;  %374 = vset.pattern.permute.xlu0 %v375_v3  ;;  %v40_v12 = vld [vmem:[%s614_s1 + $0x90] sm:$0xff] }
   0x2   :  { %v22_v2 = vld [vmem:[%s614_s1] sm:$0xff]  ;;  %v309_v4 = vpack.c.bf16 %v39_v1, %v38_v0  ;;  %v23_v5 = vld [vmem:[%s614_s1 + $0x8] sm:$0xff]  ;;  %v41_v14 = vld [vmem:[%s614_s1 + $0x98] sm:$0xff] }
   0x3   :  { %v70_v6 = vld [vmem:[%s614_s1 + $0x180] sm:$0xff]  ;;  %v71_v7 = vld [vmem:[%s614_s1 + $0x188] sm:$0xff]  ;;  %v311_v8 = vpack.c.bf16 %v23_v5, %v22_v2  ;;  %v24_v15 = vld [vmem:[%s614_s1 + $0x10] sm:$0xff]  ;;  %v313_v17 = vpack.c.bf16 %v41_v14, %v40_v12 }
   0x4   :  { %v341_v9 = vpack.c.bf16 %v71_v7, %v70_v6  ;;  %v54_v10 = vld [vmem:[%s614_s1 + $0x100] sm:$0xff]  ;;  %v55_v11 = vld [vmem:[%s614_s1 + $0x108] sm:$0xff]  ;;  %310 = vmatprep.subr.bf16.mxu0 %v309_v4  ;;  %v25_v16 = vld [vmem:[%s614_s1 + $0x18] sm:$0xff] }
   0x5   :  { %v343_v13 = vpack.c.bf16 %v55_v11, %v54_v10  ;;  %312 = vmatpush3.bf16.msra.mxu0 %v311_v8  ;;  %v315_v18 = vpack.c.bf16 %v25_v16, %v24_v15  ;;  %v72_v19 = vld [vmem:[%s614_s1 + $0x190] sm:$0xff]  ;;  %v73_v20 = vld [vmem:[%s614_s1 + $0x198] sm:$0xff]  ;;  %v42_v24 = vld [vmem:[%s614_s1 + $0xa0] sm:$0xff] }
   0x6   :  { %342 = vmatprep.subr.bf16.mxu1 %v341_v9  ;;  %v56_v21 = vld [vmem:[%s614_s1 + $0x110] sm:$0xff]  ;;  %v345_v22 = vpack.c.bf16 %v73_v20, %v72_v19  ;;  %v57_v23 = vld [vmem:[%s614_s1 + $0x118] sm:$0xff]  ;;  %v43_v25 = vld [vmem:[%s614_s1 + $0xa8] sm:$0xff]  ;;  %314 = vmatprep.subr.bf16.mxu0 %v313_v17 }
   0x7   :  { %344 = vmatpush3.bf16.msra.mxu1 %v343_v13  ;;  %v347_v26 = vpack.c.bf16 %v57_v23, %v56_v21  ;;  %v317_v27 = vpack.c.bf16 %v43_v25, %v42_v24  ;;  %v26_v28 = vld [vmem:[%s614_s1 + $0x20] sm:$0xff]  ;;  %v27_v29 = vld [vmem:[%s614_s1 + $0x28] sm:$0xff]  ;;  %v44_v36 = vld [vmem:[%s614_s1 + $0xb0] sm:$0xff] }
   0x8   :  { %v74_v30 = vld [vmem:[%s614_s1 + $0x1a0] sm:$0xff]  ;;  %346 = vmatprep.subr.bf16.mxu1 %v345_v22  ;;  %v75_v31 = vld [vmem:[%s614_s1 + $0x1a8] sm:$0xff]  ;;  %v319_v34 = vpack.c.bf16 %v27_v29, %v26_v28  ;;  %v45_v37 = vld [vmem:[%s614_s1 + $0xb8] sm:$0xff] }
   0x9   :  { %v58_v32 = vld [vmem:[%s614_s1 + $0x120] sm:$0xff]  ;;  %v59_v33 = vld [vmem:[%s614_s1 + $0x128] sm:$0xff]  ;;  %316 = vmatpush3.bf16.msra.mxu0 %v315_v18  ;;  %v349_v35 = vpack.c.bf16 %v75_v31, %v74_v30  ;;  %v28_v38 = vld [vmem:[%s614_s1 + $0x30] sm:$0xff]  ;;  %v321_v40 = vpack.c.bf16 %v45_v37, %v44_v36 }
   0xa   :  { %318 = vmatprep.subr.bf16.mxu0 %v317_v27  ;;  %v351_v39 = vpack.c.bf16 %v59_v33, %v58_v32  ;;  %v29_v41 = vld [vmem:[%s614_s1 + $0x38] sm:$0xff]  ;;  %v76_v42 = vld [vmem:[%s614_s1 + $0x1b0] sm:$0xff]  ;;  %v46_v47 = vld [vmem:[%s614_s1 + $0xc0] sm:$0xff] }
   0xb   :  { %348 = vmatpush3.bf16.msra.mxu1 %v347_v26  ;;  %v77_v43 = vld [vmem:[%s614_s1 + $0x1b8] sm:$0xff]  ;;  %v60_v45 = vld [vmem:[%s614_s1 + $0x130] sm:$0xff]  ;;  %v47_v48 = vld [vmem:[%s614_s1 + $0xc8] sm:$0xff]  ;;  %v323_v49 = vpack.c.bf16 %v29_v41, %v28_v38 }
   0xc   :  { %350 = vmatprep.subr.bf16.mxu1 %v349_v35  ;;  %v353_v44 = vpack.c.bf16 %v77_v43, %v76_v42  ;;  %v61_v46 = vld [vmem:[%s614_s1 + $0x138] sm:$0xff]  ;;  %v78_v50 = vld [vmem:[%s614_s1 + $0x1c0] sm:$0xff]  ;;  %v79_v51 = vld [vmem:[%s614_s1 + $0x1c8] sm:$0xff]  ;;  %v325_v53 = vpack.c.bf16 %v47_v48, %v46_v47 }
   0xd   :  { %320 = vmatpush3.bf16.msra.mxu0 %v319_v34  ;;  %v355_v52 = vpack.c.bf16 %v61_v46, %v60_v45  ;;  %v30_v54 = vld [vmem:[%s614_s1 + $0x40] sm:$0xff]  ;;  %v31_v55 = vld [vmem:[%s614_s1 + $0x48] sm:$0xff]  ;;  %v357_v57 = vpack.c.bf16 %v79_v51, %v78_v50  ;;  %v48_v59 = vld [vmem:[%s614_s1 + $0xd0] sm:$0xff] }
   0xe   :  { %322 = vmatprep.subr.bf16.mxu0 %v321_v40  ;;  %v62_v56 = vld [vmem:[%s614_s1 + $0x140] sm:$0xff]  ;;  %v63_v58 = vld [vmem:[%s614_s1 + $0x148] sm:$0xff]  ;;  %v49_v60 = vld [vmem:[%s614_s1 + $0xd8] sm:$0xff]  ;;  %v327_v63 = vpack.c.bf16 %v31_v55, %v30_v54 }
   0xf   :  { %352 = vmatpush3.bf16.msra.mxu1 %v351_v39  ;;  %v80_v61 = vld [vmem:[%s614_s1 + $0x1d0] sm:$0xff]  ;;  %v81_v62 = vld [vmem:[%s614_s1 + $0x1d8] sm:$0xff]  ;;  %v359_v0 = vpack.c.bf16 %v63_v58, %v62_v56  ;;  %v329_v1 = vpack.c.bf16 %v49_v60, %v48_v59  ;;  %v50_v7 = vld [vmem:[%s614_s1 + $0xe0] sm:$0xff] }
  0x10   :  { %354 = vmatprep.subr.bf16.mxu1 %v353_v44  ;;  %v32_v2 = vld [vmem:[%s614_s1 + $0x50] sm:$0xff]  ;;  %v33_v3 = vld [vmem:[%s614_s1 + $0x58] sm:$0xff]  ;;  %v361_v5 = vpack.c.bf16 %v81_v62, %v80_v61  ;;  %v51_v8 = vld [vmem:[%s614_s1 + $0xe8] sm:$0xff] }
  0x11   :  { %324 = vmatpush3.bf16.msra.mxu0 %v323_v49  ;;  %v64_v4 = vld [vmem:[%s614_s1 + $0x150] sm:$0xff]  ;;  %v65_v6 = vld [vmem:[%s614_s1 + $0x158] sm:$0xff]  ;;  %v82_v9 = vld [vmem:[%s614_s1 + $0x1e0] sm:$0xff]  ;;  %v331_v11 = vpack.c.bf16 %v33_v3, %v32_v2  ;;  %v333_v16 = vpack.c.bf16 %v51_v8, %v50_v7 }
  0x12   :  { %326 = vmatprep.subr.bf16.mxu0 %v325_v53  ;;  %v83_v10 = vld [vmem:[%s614_s1 + $0x1e8] sm:$0xff]  ;;  %v34_v12 = vld [vmem:[%s614_s1 + $0x60] sm:$0xff]  ;;  %v363_v15 = vpack.c.bf16 %v65_v6, %v64_v4  ;;  %v52_v18 = vld [vmem:[%s614_s1 + $0xf0] sm:$0xff] }
  0x13   :  { %356 = vmatpush3.bf16.msra.mxu1 %v355_v52  ;;  %v35_v13 = vld [vmem:[%s614_s1 + $0x68] sm:$0xff]  ;;  %v66_v14 = vld [vmem:[%s614_s1 + $0x160] sm:$0xff]  ;;  %v365_v20 = vpack.c.bf16 %v83_v10, %v82_v9  ;;  %v53_v21 = vld [vmem:[%s614_s1 + $0xf8] sm:$0xff] }
  0x14   :  { %358 = vmatprep.subr.bf16.mxu1 %v357_v57  ;;  %v67_v17 = vld [vmem:[%s614_s1 + $0x168] sm:$0xff]  ;;  %v20_v22 = vld [vmem:[%s615_s0 + $0x18] sm:$0xff]  ;;  %v21_v23 = vld [vmem:[%s616_s2] sm:$0xff]  ;;  %v335_v26 = vpack.c.bf16 %v35_v13, %v34_v12  ;;  %v337_v28 = vpack.c.bf16 %v53_v21, %v52_v18 }
  0x15   :  { %328 = vmatpush3.bf16.msra.mxu0 %v327_v63  ;;  %v18_v19 = vld [vmem:[%s615_s0 + $0x8] sm:$0xff]  ;;  %v84_v24 = vld [vmem:[%s614_s1 + $0x1f0] sm:$0xff]  ;;  %v85_v25 = vld [vmem:[%s614_s1 + $0x1f8] sm:$0xff]  ;;  %225 = vmatprep.mubr.f32.mxu1 %v20_v22  ;;  %v367_v27 = vpack.c.bf16 %v67_v17, %v66_v14 }
  0x16   :  { %330 = vmatprep.subr.bf16.mxu0 %v329_v1  ;;  %155 = vmatprep.mubr.f32.mxu0 %v18_v19  ;;  %v36_v29 = vld [vmem:[%s614_s1 + $0x70] sm:$0xff]  ;;  %v37_v30 = vld [vmem:[%s614_s1 + $0x78] sm:$0xff]  ;;  %v369_v31 = vpack.c.bf16 %v85_v25, %v84_v24  ;;  %v17_v36 = vld [vmem:[%s615_s0] sm:$0xff] }
  0x17   :  { %360 = vmatpush3.bf16.msra.mxu1 %v359_v0  ;;  %88 = vperm.xlu0 %374, %v21_v23   ;;  %v68_v32 = vld [vmem:[%s614_s1 + $0x170] sm:$0xff]  ;;  %v69_v33 = vld [vmem:[%s614_s1 + $0x178] sm:$0xff]  ;;  %v339_v34 = vpack.c.bf16 %v37_v30, %v36_v29  ;;  %v231_v46 = vld [vmem:[%s617_s3] sm:$0xff] }
  0x18   :  { %362 = vmatprep.subr.bf16.mxu1 %v361_v5  ;;  %v371_v35 = vpack.c.bf16 %v69_v33, %v68_v32  ;;  %v19_v37 = vld [vmem:[%s615_s0 + $0x10] sm:$0xff] }
  0x19   :  { %332 = vmatpush3.bf16.msra.mxu0 %v331_v11 }
  0x1a   :  { %334 = vmatprep.subr.bf16.mxu0 %v333_v16 }
  0x1b   :  { %364 = vmatpush3.bf16.msra.mxu1 %v363_v15 }
  0x1c   :  { %366 = vmatprep.subr.bf16.mxu1 %v365_v20 }
  0x1d   :  { %336 = vmatpush3.bf16.msra.mxu0 %v335_v26 }
  0x1e   :  { %338 = vmatprep.subr.bf16.mxu0 %v337_v28 }
  0x1f   :  { %368 = vmatpush3.bf16.msra.mxu1 %v367_v27 }
  0x20   :  { %370 = vmatprep.subr.bf16.mxu1 %v369_v31 }
  0x21   :  { %340 = vmatpush3.bf16.msra.mxu0 %v339_v34 }
  0x23   :  { %372 = vmatpush3.bf16.msra.mxu1 %v371_v35 }
  0x24   :  { %156 = vmatmul.mubr.f32.vlgmr.msra.gmra.mrb[0].mxu0 %v17_v36 }
  0x26   :  { %226 = vmatmul.mubr.f32.vlgmr.msra.gmra.mrb[0].mxu1 %v19_v37 }
  0x96   :  { %v89_v39 = vpop.permute.xlu0 %88 }
  0xf7   :  { %v271_v38 = vpop.f32.mrb[0].mxu0 }
  0xf8   :  { %v272_v40 = vpop.f32.mrb[1].mxu0 }
  0xf9   :  { %v306_v41 = vpop.f32.mrb[0].mxu1  ;;  %v273_v42 = vadd.f32 %v272_v40, %v271_v38 }
  0xfa   :  { %v307_v43 = vpop.f32.mrb[1].mxu1 }
  0xfb   :  { %v308_v44 = vadd.f32 %v307_v43, %v306_v41  ;;  %v158_v45 = vadd.f32 %v273_v42, %v89_v39 }
  0xfd   :  { %v228_v47 = vadd.f32 %v308_v44, %v158_v45 }
  0xff   :  { %v232_v48 = vadd.f32 %v231_v46, %v228_v47 }
 0x101   :  { %234 = vst.msk [vmem:[%s618_s4] sm:$0xff] %vm233_vm0, %v232_v48 }

</bundles_post_ra>
